<compile_context>
chip_gen: v5e
topology: v5e:2x2
jax: 0.10.0
libtpu: 0.0.40
codegen_flags: <defaults>
</compile_context>

<pallas_src>
import jax
import jax.numpy as jnp
from jax.experimental import pallas as pl
from jax.experimental.pallas import tpu as pltpu


# ----------------------------------------------------------------------------
# Pallas kernel: full forward pass, everything resident in VMEM.
# ----------------------------------------------------------------------------
def anomaly_kernel(a_ref, x_ref, w1_ref, w2_ref, w3_ref, fw_ref, bias_ref, o_ref):
    f32 = jnp.float32
    bf16 = jnp.bfloat16

    h1 = w1_ref.shape[1]          # 300
    h2 = w2_ref.shape[1]          # 100
    h3 = w3_ref.shape[1]          # out_channels

    a = a_ref[...]                # [N, N] bf16 normalized adjacency
    bias = bias_ref[...]          # [4, h1] f32 packed biases
    b1 = bias[0:1, :h1]
    b2 = bias[1:2, :h2]
    b3 = bias[2:3, :h3]
    fb = bias[3:4, :1]            # fused fc bias

    # conv1 (reassociated): relu( (Â @ x) @ W1 + b1 )   -- C_in << h1 so contract C_in first
    ax = jnp.dot(a, x_ref[...], preferred_element_type=f32)                   # [N, C_in] f32
    h = jnp.dot(ax.astype(bf16), w1_ref[...], preferred_element_type=f32) + b1
    h = jnp.maximum(h, 0.0)

    # conv2: relu( Â @ (h @ W2) + b2 )   -- original association is cheaper here (h2 < h1)
    h = jnp.dot(h.astype(bf16), w2_ref[...], preferred_element_type=f32)
    h = jnp.dot(a, h.astype(bf16), preferred_element_type=f32) + b2
    h = jnp.maximum(h, 0.0)

    # conv3: relu( Â @ (h @ W3) + b3 )
    h = jnp.dot(h.astype(bf16), w3_ref[...], preferred_element_type=f32)
    h = jnp.dot(a, h.astype(bf16), preferred_element_type=f32) + b3
    h = jnp.maximum(h, 0.0)

    # fused fc1+fc2 (no activation between them in the reference forward)
    h = jnp.dot(h.astype(bf16), fw_ref[...], preferred_element_type=f32) + fb

    o_ref[...] = h.astype(o_ref.dtype)                                        # [N, 1]


def anomaly_anticipation_forward(a_hat, x, params):
    """Fused forward.  a_hat: [N,N] f32 normalized adjacency, x: [N,in_channels] f32."""
    n = x.shape[0]
    h1 = params["w1"].shape[1]
    h2 = params["w2"].shape[1]
    c_out = params["w3"].shape[1]

    # Fuse fc1/fc2 algebraically (no activation between them).
    fw = params["fw1"] @ params["fw2"]                       # [c_out, 1]
    fb = params["fb1"] @ params["fw2"] + params["fb2"]       # [1, 1]

    # Pack all bias rows into one VMEM operand (cuts DMA-descriptor count).
    bias_pack = jnp.zeros((4, h1), jnp.float32)
    bias_pack = bias_pack.at[0, :h1].set(params["b1"][0])
    bias_pack = bias_pack.at[1, :h2].set(params["b2"][0])
    bias_pack = bias_pack.at[2, :c_out].set(params["b3"][0])
    bias_pack = bias_pack.at[3, :1].set(fb[0])

    bf16 = jnp.bfloat16
    operands = (a_hat.astype(bf16), x.astype(bf16),
                params["w1"].astype(bf16), params["w2"].astype(bf16),
                params["w3"].astype(bf16), fw.astype(bf16), bias_pack)

    # TODO(synk): for large graphs (dense Â no longer VMEM-resident: N >~ 4k on v7x,
    # ~5.7k on v5e/v6e in f32; 2x that in bf16) switch to a row-tiled BlockSpec path:
    # tile Â and activations over node rows, keep weights resident via constant
    # index_maps, and mark the Â-column reduction axis "arbitrary".
    vmem = pl.BlockSpec(memory_space=pltpu.MemorySpace.VMEM)
    return pl.pallas_call(
        anomaly_kernel,
        out_shape=jax.ShapeDtypeStruct((n, 1), jnp.float32),
        in_specs=[vmem] * len(operands),
        out_specs=vmem,
    )(*operands)


# ----------------------------------------------------------------------------
# Host-side glue: GCN normalization of edge_index (dense), deterministic params.
# ----------------------------------------------------------------------------
def gcn_normalized_adjacency(edge_index, num_nodes):
    """Â = D^-1/2 (A + I) D^-1/2.  A[dst, src] accumulates multi-edges (PyG gcn_norm
    parity); every node gets a unit self-loop (add_remaining_self_loops semantics)."""
    src, dst = edge_index[0], edge_index[1]
    w = jnp.where(src != dst, 1.0, 0.0)                  # off-diagonal edges only
    a = jnp.zeros((num_nodes, num_nodes), jnp.float32)
    a = a.at[dst, src].add(w)
    a = a + jnp.eye(num_nodes, dtype=jnp.float32)        # unit self-loop on every node
    deg = jnp.sum(a, axis=1)                             # in-degree incl. self-loop (>= 1)
    dinv = jax.lax.rsqrt(deg)
    return dinv[:, None] * a * dinv[None, :]


def init_params(key, in_channels, out_channels):
    dims = [
        ("w1", (in_channels, 300)),  ("b1", (1, 300)),
        ("w2", (300, 100)),          ("b2", (1, 100)),
        ("w3", (100, out_channels)), ("b3", (1, out_channels)),
        ("fw1", (out_channels, 16)), ("fb1", (1, 16)),
        ("fw2", (16, 1)),            ("fb2", (1, 1)),
    ]
    params = {}
    for name, shape in dims:
        key, sub = jax.random.split(key)
        fan_in = shape[0] if name.startswith(("w", "fw")) else shape[1]
        scale = 1.0 / jnp.sqrt(jnp.float32(fan_in))
        params[name] = scale * jax.random.normal(sub, shape, jnp.float32)
    return params


# ----------------------------------------------------------------------------
# References for correctness checks.
# ----------------------------------------------------------------------------
def reference_forward_matched(a_hat, x, p):
    """Same algebra + bf16-input / f32-accum matmul policy as the kernel (tight check)."""
    bf16, f32 = jnp.bfloat16, jnp.float32

    def mm(lhs, rhs):
        return jnp.dot(lhs.astype(bf16), rhs.astype(bf16), preferred_element_type=f32)

    h = jnp.maximum(mm(mm(a_hat, x), p["w1"]) + p["b1"], 0.0)
    h = jnp.maximum(mm(a_hat, mm(h, p["w2"])) + p["b2"], 0.0)
    h = jnp.maximum(mm(a_hat, mm(h, p["w3"])) + p["b3"], 0.0)
    fw = p["fw1"] @ p["fw2"]
    fb = p["fb1"] @ p["fw2"] + p["fb2"]
    return mm(h, fw) + fb


def reference_forward_f32(a_hat, x, p):
    """Original (unfused, unreassociated) f32 module semantics (loose check)."""
    h = jnp.maximum(a_hat @ (x @ p["w1"]) + p["b1"], 0.0)
    h = jnp.maximum(a_hat @ (h @ p["w2"]) + p["b2"], 0.0)
    h = jnp.maximum(a_hat @ (h @ p["w3"]) + p["b3"], 0.0)
    h = h @ p["fw1"] + p["fb1"]
    h = h @ p["fw2"] + p["fb2"]
    return h


if __name__ == "__main__":
    key = jax.random.PRNGKey(0)

    num_nodes = 64
    in_channels = 32
    out_channels = 8
    num_edges = 128

    k_x, k_src, k_dst, k_p = jax.random.split(key, 4)
    x = jax.random.normal(k_x, (num_nodes, in_channels), jnp.float32)
    src = jax.random.randint(k_src, (num_edges,), 0, num_nodes)
    dst = jax.random.randint(k_dst, (num_edges,), 0, num_nodes)
    edge_index = jnp.stack([src, dst], axis=0)            # [2, E], like PyG

    params = init_params(k_p, in_channels, out_channels)
    a_hat = gcn_normalized_adjacency(edge_index, num_nodes)

    forward = jax.jit(anomaly_anticipation_forward)
    out = jax.block_until_ready(forward(a_hat, x, params))

    assert out.shape == (num_nodes, 1)
    ref_matched = reference_forward_matched(a_hat, x, params)
    ref_f32 = reference_forward_f32(a_hat, x, params)
    assert jnp.allclose(out, ref_matched, atol=2e-3, rtol=2e-3)   # kernel mechanics
    assert jnp.allclose(out, ref_f32, atol=8e-2, rtol=8e-2)       # module semantics (bf16 slack)

    print("KERNEL_OK")
</pallas_src>

<mosaic_0001>
module attributes {stable_mosaic.version = 11 : i64} {
  func.func @anomaly_kernel(%arg0: memref<64x64xbf16, #tpu.memory_space<vmem>>, %arg1: memref<64x32xbf16, #tpu.memory_space<vmem>>, %arg2: memref<32x300xbf16, #tpu.memory_space<vmem>>, %arg3: memref<300x100xbf16, #tpu.memory_space<vmem>>, %arg4: memref<100x8xbf16, #tpu.memory_space<vmem>>, %arg5: memref<8x1xbf16, #tpu.memory_space<vmem>>, %arg6: memref<4x300xf32, #tpu.memory_space<vmem>>, %arg7: memref<64x1xf32, #tpu.memory_space<vmem>>) attributes {dimension_semantics = [], scalar_prefetch = 0 : i64, scratch_operands = 0 : i64, tpu.core_type = #tpu.core_type<tc>} {
    %c0 = arith.constant 0 : index
    %c0_0 = arith.constant 0 : index
    %0 = vector.load %arg0[%c0, %c0_0] : memref<64x64xbf16, #tpu.memory_space<vmem>>, vector<64x64xbf16>
    %c0_1 = arith.constant 0 : index
    %c0_2 = arith.constant 0 : index
    %1 = vector.load %arg6[%c0_1, %c0_2] : memref<4x300xf32, #tpu.memory_space<vmem>>, vector<4x300xf32>
    %2 = vector.extract_strided_slice %1 {offsets = [0, 0], sizes = [1, 300], strides = [1, 1]} : vector<4x300xf32> to vector<1x300xf32>
    %3 = vector.extract_strided_slice %1 {offsets = [1, 0], sizes = [1, 100], strides = [1, 1]} : vector<4x300xf32> to vector<1x100xf32>
    %4 = vector.extract_strided_slice %1 {offsets = [2, 0], sizes = [1, 8], strides = [1, 1]} : vector<4x300xf32> to vector<1x8xf32>
    %5 = vector.extract_strided_slice %1 {offsets = [3, 0], sizes = [1, 1], strides = [1, 1]} : vector<4x300xf32> to vector<1x1xf32>
    %c0_3 = arith.constant 0 : index
    %c0_4 = arith.constant 0 : index
    %6 = vector.load %arg1[%c0_3, %c0_4] : memref<64x32xbf16, #tpu.memory_space<vmem>>, vector<64x32xbf16>
    %cst = arith.constant dense<0.000000e+00> : vector<64x32xf32>
    %7 = tpu.matmul %0, %6, %cst {dimension_numbers = #tpu.dot_dimension_numbers<[1], [0], [0], [1], [0, 0, 1, 1], [], []>} : vector<64x64xbf16>, vector<64x32xbf16>, vector<64x32xf32> -> vector<64x32xf32>
    %8 = arith.truncf %7 : vector<64x32xf32> to vector<64x32xbf16>
    %c0_5 = arith.constant 0 : index
    %c0_6 = arith.constant 0 : index
    %9 = vector.load %arg2[%c0_5, %c0_6] : memref<32x300xbf16, #tpu.memory_space<vmem>>, vector<32x300xbf16>
    %cst_7 = arith.constant dense<0.000000e+00> : vector<64x300xf32>
    %10 = tpu.matmul %8, %9, %cst_7 {dimension_numbers = #tpu.dot_dimension_numbers<[1], [0], [0], [1], [0, 0, 1, 1], [], []>} : vector<64x32xbf16>, vector<32x300xbf16>, vector<64x300xf32> -> vector<64x300xf32>
    %11 = vector.broadcast %2 : vector<1x300xf32> to vector<64x300xf32>
    %12 = arith.addf %10, %11 : vector<64x300xf32>
    %cst_8 = arith.constant 0.000000e+00 : f32
    %13 = vector.broadcast %cst_8 : f32 to vector<64x300xf32>
    %14 = arith.maximumf %12, %13 : vector<64x300xf32>
    %15 = arith.truncf %14 : vector<64x300xf32> to vector<64x300xbf16>
    %c0_9 = arith.constant 0 : index
    %c0_10 = arith.constant 0 : index
    %16 = vector.load %arg3[%c0_9, %c0_10] : memref<300x100xbf16, #tpu.memory_space<vmem>>, vector<300x100xbf16>
    %cst_11 = arith.constant dense<0.000000e+00> : vector<64x100xf32>
    %17 = tpu.matmul %15, %16, %cst_11 {dimension_numbers = #tpu.dot_dimension_numbers<[1], [0], [0], [1], [0, 0, 1, 1], [], []>} : vector<64x300xbf16>, vector<300x100xbf16>, vector<64x100xf32> -> vector<64x100xf32>
    %18 = arith.truncf %17 : vector<64x100xf32> to vector<64x100xbf16>
    %cst_12 = arith.constant dense<0.000000e+00> : vector<64x100xf32>
    %19 = tpu.matmul %0, %18, %cst_12 {dimension_numbers = #tpu.dot_dimension_numbers<[1], [0], [0], [1], [0, 0, 1, 1], [], []>} : vector<64x64xbf16>, vector<64x100xbf16>, vector<64x100xf32> -> vector<64x100xf32>
    %20 = vector.broadcast %3 : vector<1x100xf32> to vector<64x100xf32>
    %21 = arith.addf %19, %20 : vector<64x100xf32>
    %cst_13 = arith.constant 0.000000e+00 : f32
    %22 = vector.broadcast %cst_13 : f32 to vector<64x100xf32>
    %23 = arith.maximumf %21, %22 : vector<64x100xf32>
    %24 = arith.truncf %23 : vector<64x100xf32> to vector<64x100xbf16>
    %c0_14 = arith.constant 0 : index
    %c0_15 = arith.constant 0 : index
    %25 = vector.load %arg4[%c0_14, %c0_15] : memref<100x8xbf16, #tpu.memory_space<vmem>>, vector<100x8xbf16>
    %cst_16 = arith.constant dense<0.000000e+00> : vector<64x8xf32>
    %26 = tpu.matmul %24, %25, %cst_16 {dimension_numbers = #tpu.dot_dimension_numbers<[1], [0], [0], [1], [0, 0, 1, 1], [], []>} : vector<64x100xbf16>, vector<100x8xbf16>, vector<64x8xf32> -> vector<64x8xf32>
    %27 = arith.truncf %26 : vector<64x8xf32> to vector<64x8xbf16>
    %cst_17 = arith.constant dense<0.000000e+00> : vector<64x8xf32>
    %28 = tpu.matmul %0, %27, %cst_17 {dimension_numbers = #tpu.dot_dimension_numbers<[1], [0], [0], [1], [0, 0, 1, 1], [], []>} : vector<64x64xbf16>, vector<64x8xbf16>, vector<64x8xf32> -> vector<64x8xf32>
    %29 = vector.broadcast %4 : vector<1x8xf32> to vector<64x8xf32>
    %30 = arith.addf %28, %29 : vector<64x8xf32>
    %cst_18 = arith.constant 0.000000e+00 : f32
    %31 = vector.broadcast %cst_18 : f32 to vector<64x8xf32>
    %32 = arith.maximumf %30, %31 : vector<64x8xf32>
    %33 = arith.truncf %32 : vector<64x8xf32> to vector<64x8xbf16>
    %c0_19 = arith.constant 0 : index
    %c0_20 = arith.constant 0 : index
    %34 = vector.load %arg5[%c0_19, %c0_20] : memref<8x1xbf16, #tpu.memory_space<vmem>>, vector<8x1xbf16>
    %cst_21 = arith.constant dense<0.000000e+00> : vector<64x1xf32>
    %35 = tpu.matmul %33, %34, %cst_21 {dimension_numbers = #tpu.dot_dimension_numbers<[1], [0], [0], [1], [0, 0, 1, 1], [], []>} : vector<64x8xbf16>, vector<8x1xbf16>, vector<64x1xf32> -> vector<64x1xf32>
    %36 = vector.broadcast %5 : vector<1x1xf32> to vector<64x1xf32>
    %37 = arith.addf %35, %36 : vector<64x1xf32>
    %c0_22 = arith.constant 0 : index
    %c0_23 = arith.constant 0 : index
    %38 = vector.load %arg7[%c0_22, %c0_23] : memref<64x1xf32, #tpu.memory_space<vmem>>, vector<64x1xf32>
    tpu.vector_store %arg7[%c0_22, %c0_23], %37 {strides = array<i32>} : memref<64x1xf32, #tpu.memory_space<vmem>>, vector<64x1xf32>,
    return
  }
}

</mosaic_0001>

<bundles_post_ra>
// kernel: anomaly_anticipation_forward.1
= control target key start
LH: loop header
LB: loop body
LE: loop exit
PB: predicated region body
PF: predicated region fallthrough
CT: control target
= control target key end

     0   :  { %vm89_vm0 = vcmask 523264   ;;  %vm186_vm1 = vcmask 261120   ;;  %vm486_vm2 = vcmask 1045504   ;;  %vm473_vm3 = vcmask 359424   ;;  %s1376_s1 = inlined_call_operand.vmem [shape: bf16[64,32], index: 1, kind: input, shape index: {}]   ;;  %s1377_s0 = inlined_call_operand.vmem [shape: bf16[64,64], index: 0, kind: input, shape index: {}]   ;;  %s1378_s2 = inlined_call_operand.vmem [shape: bf16[32,300], index: 2, kind: input, shape index: {}]   ;;  %s1379_s3 = inlined_call_operand.vmem [shape: bf16[300,100], index: 3, kind: input, shape index: {}]   ;;  %s1380_s6 = inlined_call_operand.vmem [shape: f32[4,300], index: 6, kind: input, shape index: {}]   ;;  %s1381_s4 = inlined_call_operand.vmem [shape: bf16[100,8], index: 4, kind: input, shape index: {}]   ;;  %s1382_s5 = inlined_call_operand.vmem [shape: bf16[8,1], index: 5, kind: input, shape index: {}]   ;;  %s1383_s7 = inlined_call_operand.vmem [shape: f32[64,1], index: 7, kind: output, shape index: {}]  }
   0x1   :  { %v1027_v0 = vld [vmem:[%s1376_s1 + $0x18] sm:$0xff]  ;;  %v1026_v1 = vld [vmem:[%s1376_s1 + $0x10] sm:$0xff]  ;;  %v1025_v2 = vld [vmem:[%s1376_s1 + $0x8] sm:$0xff]  ;;  %vm688_vm4 = vcmask 1041408   ;;  %vm675_vm5 = vcmask 818176   ;;  %vm782_vm6 = vcmask 1043456  }
   0x2   :  { %106 = vmatpush.bf16.msra.mxu0 %v1027_v0  ;;  %v1024_v3 = vld [vmem:[%s1376_s1] sm:$0xff]  ;;  %v1123_v5 = vld [vmem:[%s1377_s0 + $0x8] sm:$0xff]  ;;  %v1130_v6 = vld [vmem:[%s1377_s0 + $0x10] sm:$0xff]  ;;  %vm769_vm7 = vcmask 64512   ;;  %vm815_vm8 = vcmask 7168  }
   0x3   :  { %v1116_v4 = vld [vmem:[%s1377_s0] sm:$0xff]  ;;  %v1137_v7 = vld [vmem:[%s1377_s0 + $0x18] sm:$0xff]  ;;  %v880_v12 = vld [vmem:[%s1378_s2 + $0x24] sm:$0xf0] }
   0x4   :  { %v878_v8 = vld [vmem:[%s1378_s2 + $0x18] sm:$0xf]  ;;  %v1032_v9 = vld [vmem:[%s1378_s2 + $0x20] sm:$0xf0]  ;;  %v1031_v10 = vld [vmem:[%s1378_s2 + $0x1c] sm:$0xf] }
   0x5   :  { %v879_v11 = vor.u32 %v1032_v9, %v878_v8  ;;  %v886_v13 = vld [vmem:[%s1378_s2 + $0x20] sm:$0xf]  ;;  %v1033_v14 = vld [vmem:[%s1378_s2 + $0x28] sm:$0xf0]  ;;  %v883_v15 = vor.u32 %v1031_v10, %v880_v12  ;;  %v1028_v19 = vld [vmem:[%s1378_s2 + $0x4] sm:$0xf] }
   0x6   :  { %107 = vmatpush.bf16.msra.mxu0 %v1026_v1  ;;  %v887_v16 = vor.u32 %v1033_v14, %v886_v13  ;;  %v866_v17 = vld [vmem:[%s1378_s2] sm:$0xf]  ;;  %v1029_v18 = vld [vmem:[%s1378_s2 + $0x8] sm:$0xf0]  ;;  %v868_v21 = vld [vmem:[%s1378_s2 + $0xc] sm:$0xf0] }
   0x7   :  { %1059 = vmatpush.bf16.msra.mxu1 %v879_v11  ;;  %234 = vmatpush.bf16.msra.mxu2 %v883_v15  ;;  %v867_v20 = vor.u32 %v1029_v18, %v866_v17  ;;  %v874_v22 = vld [vmem:[%s1378_s2 + $0x8] sm:$0xf]  ;;  %v1030_v23 = vld [vmem:[%s1378_s2 + $0x10] sm:$0xf0]  ;;  %v871_v24 = vor.u32 %v1028_v19, %v868_v21  ;;  %v1041_v32 = vld [vmem:[%s1379_s3 + $0x38] sm:$0xff] }
   0x8   :  { %263 = vmatpush.bf16.msra.mxu3 %v887_v16  ;;  %v875_v25 = vor.u32 %v1030_v23, %v874_v22  ;;  %v1049_v33 = vld [vmem:[%s1379_s3 + $0x78] sm:$0xff]  ;;  %v1040_v34 = vld [vmem:[%s1379_s3 + $0x30] sm:$0xff]  ;;  %v1039_v37 = vld [vmem:[%s1379_s3 + $0x28] sm:$0xff] }
   0x9   :  { %v1048_v35 = vld [vmem:[%s1379_s3 + $0x70] sm:$0xff]  ;;  %v1047_v38 = vld [vmem:[%s1379_s3 + $0x68] sm:$0xff]  ;;  %v1038_v39 = vld [vmem:[%s1379_s3 + $0x20] sm:$0xff] }
   0xa   :  { %108 = vmatpush.bf16.msra.mxu0 %v1025_v2  ;;  %v1037_v45 = vld [vmem:[%s1379_s3 + $0x18] sm:$0xff]  ;;  %v1046_v46 = vld [vmem:[%s1379_s3 + $0x60] sm:$0xff]  ;;  %v1036_v47 = vld [vmem:[%s1379_s3 + $0x10] sm:$0xff] }
   0xb   :  { %1060 = vmatpush.bf16.msra.mxu1 %v867_v20  ;;  %235 = vmatpush.bf16.msra.mxu2 %v871_v24  ;;  %v1045_v48 = vld [vmem:[%s1379_s3 + $0x58] sm:$0xff]  ;;  %v1035_v49 = vld [vmem:[%s1379_s3 + $0x8] sm:$0xff]  ;;  %v974_v50 = vld [vmem:[%s1379_s3 + $0x90] sm:$0xf] }
   0xc   :  { %264 = vmatpush.bf16.msra.mxu3 %v875_v25  ;;  %v1052_v51 = vld [vmem:[%s1379_s3 + $0x90] sm:$0x30]  ;;  %v1034_v55 = vld [vmem:[%s1379_s3] sm:$0xff]  ;;  %v1043_v56 = vld [vmem:[%s1379_s3 + $0x48] sm:$0xff] }
   0xd   :  { %v975_v52 = vor.u32 %v1052_v51, %v974_v50  ;;  %v1044_v53 = vld [vmem:[%s1379_s3 + $0x50] sm:$0xff]  ;;  %v1051_v57 = vld [vmem:[%s1379_s3 + $0x88] sm:$0xff]  ;;  %v1042_v58 = vld [vmem:[%s1379_s3 + $0x40] sm:$0xff] }
   0xe   :  { %109 = vmatpush.bf16.msra.mxu0 %v1024_v3  ;;  %v1050_v59 = vld [vmem:[%s1379_s3 + $0x80] sm:$0xff]  ;;  %v36_v0 = vld [vmem:[%s1380_s6 + $0x8] sm:$0xf] }
   0xf   :  { %490 = vmatpush.bf16.msrb.mxu1 %v1041_v32  ;;  %519 = vmatpush.bf16.msrb.mxu2 %v1049_v33  ;;  %v488_v54 = vsel %vm486_vm2, %v975_v52, 0  ;;  %v1252_v60 = vld [vmem:[%s1380_s6] sm:$0xff]  ;;  %v147_v3 = vperm.slane %v36_v0, 0 }
  0x10   :  { %553 = vmatpush.bf16.msrb.mxu3 %v488_v54  ;;  %v145_v61 = vperm.slane %v1252_v60, 0  ;;  %v146_v1 = vperm.slane %v1252_v60, 4 }
  0x11   :  { %860 = vmatmul.msk.bf16.vlgmr.msra.gmra.mxu0 %vm89_vm0, %v1116_v4  ;;  %v1265_v13 = vperm.slane %v147_v3, 0 }
  0x12   :  { %205 = vmatpush.bf16.msrb.mxu0 %v879_v11  ;;  %v1255_v63 = vperm.slane %v145_v61, 0  ;;  %v1262_v11 = vperm.slane %v146_v1, 0 }
  0x13   :  { %491 = vmatpush.bf16.msrb.mxu1 %v1040_v34  ;;  %520 = vmatpush.bf16.msrb.mxu2 %v1048_v35 }
  0x14   :  { %554 = vmatpush.bf16.msrb.mxu3 %v1051_v57 }
  0x16   :  { %206 = vmatpush.bf16.msrb.mxu0 %v867_v20 }
  0x17   :  { %492 = vmatpush.bf16.msrb.mxu1 %v1039_v37  ;;  %521 = vmatpush.bf16.msrb.mxu2 %v1047_v38 }
  0x18   :  { %555 = vmatpush.bf16.msrb.mxu3 %v1050_v59 }
  0x1b   :  { %493 = vmatpush.bf16.msrb.mxu1 %v1038_v39  ;;  %522 = vmatpush.bf16.msrb.mxu2 %v1046_v46 }
  0x1f   :  { %494 = vmatpush.bf16.msrb.mxu1 %v1037_v45  ;;  %523 = vmatpush.bf16.msrb.mxu2 %v1045_v48 }
  0x21   :  { %861 = vmatmul.msk.bf16.gmra.mxu0 %vm89_vm0, %v1123_v5 }
  0x23   :  { %495 = vmatpush.bf16.msrb.mxu1 %v1036_v47  ;;  %524 = vmatpush.bf16.msrb.mxu2 %v1044_v53 }
  0x27   :  { %496 = vmatpush.bf16.msrb.mxu1 %v1035_v49  ;;  %525 = vmatpush.bf16.msrb.mxu2 %v1043_v56 }
  0x2b   :  { %497 = vmatpush.bf16.msrb.mxu1 %v1034_v55  ;;  %526 = vmatpush.bf16.msrb.mxu2 %v1042_v58 }
  0x31   :  { %862 = vmatmul.msk.bf16.gmra.mxu0 %vm89_vm0, %v1130_v6 }
  0x41   :  { %863 = vmatmul.msk.bf16.gmra.mxu0 %vm89_vm0, %v1137_v7 }
  0x8e   :  { %v111_v26 = vpop.f32.mrf.mxu0 }
  0x96   :  { %v113_v27 = vpop.f32.mrf.mxu0 }
  0x97   :  { %v131_v28 = vpack.c.bf16 %v113_v27, %v111_v26 }
  0x99   :  { %888 = vmatmul.msk.bf16.vlgmr.msrb.gmra.mxu0 %vm186_vm1, %v131_v28  ;;  %892 = vmatmul.msk.bf16.vlgmr.msra.gmra.mxu2 %vm186_vm1, %v131_v28 }
  0x9a   :  { %896 = vmatmul.msk.bf16.vlgmr.msra.gmra.mxu3 %vm186_vm1, %v131_v28 }
  0x9e   :  { %v116_v29 = vpop.f32.mrf.mxu0 }
  0xa6   :  { %v118_v30 = vpop.f32.mrf.mxu0 }
  0xa7   :  { %v132_v31 = vpack.c.bf16 %v118_v30, %v116_v29 }
  0xa9   :  { %889 = vmatmul.msk.bf16.gmra.mxu0 %vm186_vm1, %v132_v31  ;;  %893 = vmatmul.msk.bf16.gmra.mxu2 %vm186_vm1, %v132_v31 }
  0xaa   :  { %897 = vmatmul.msk.bf16.gmra.mxu3 %vm186_vm1, %v132_v31 }
  0xae   :  { %v121_v36 = vpop.f32.mrf.mxu0 }
  0xb6   :  { %v123_v40 = vpop.f32.mrf.mxu0 }
  0xb7   :  { %v133_v41 = vpack.c.bf16 %v123_v40, %v121_v36 }
  0xb9   :  { %890 = vmatmul.msk.bf16.vlgmr.msra.gmra.mxu1 %vm186_vm1, %v133_v41  ;;  %894 = vmatmul.msk.bf16.gmra.mxu2 %vm186_vm1, %v133_v41 }
  0xba   :  { %898 = vmatmul.msk.bf16.gmra.mxu3 %vm186_vm1, %v133_v41 }
  0xbe   :  { %v126_v42 = vpop.f32.mrf.mxu0 }
  0xc6   :  { %v128_v43 = vpop.f32.mrf.mxu0 }
  0xc7   :  { %v134_v44 = vpack.c.bf16 %v128_v43, %v126_v42 }
  0xc9   :  { %891 = vmatmul.msk.bf16.gmra.mxu1 %vm186_vm1, %v134_v44  ;;  %895 = vmatmul.msk.bf16.gmra.mxu2 %vm186_vm1, %v134_v44 }
  0xca   :  { %899 = vmatmul.msk.bf16.gmra.mxu3 %vm186_vm1, %v134_v44 }
 0x116   :  { %v208_v62 = vpop.f32.mrf.mxu0 }
 0x117   :  { %v209_v8 = vadd.f32 %v208_v62, %v1255_v63 }
 0x119   :  { %v286_v14 = vmax.f32 %v209_v8, 0.0 }
 0x11c   :  { %v237_v2 = vpop.f32.mrf.mxu2 }
 0x11d   :  { %v266_v9 = vpop.f32.mrf.mxu3  ;;  %v238_v16 = vadd.f32 %v237_v2, %v1262_v11 }
 0x11e   :  { %v210_v10 = vpop.f32.mrf.mxu0  ;;  %v267_v18 = vadd.f32 %v266_v9, %v1265_v13 }
 0x11f   :  { %v211_v12 = vadd.f32 %v210_v10, %v1255_v63  ;;  %v287_v24 = vmax.f32 %v238_v16, 0.0 }
 0x120   :  { %v288_v26 = vmax.f32 %v267_v18, 0.0 }
 0x121   :  { %v289_v15 = vmax.f32 %v211_v12, 0.0 }
 0x123   :  { %v310_v17 = vpack.c.bf16 %v289_v15, %v286_v14 }
 0x124   :  { %v239_v19 = vpop.f32.mrf.mxu2 }
 0x125   :  { %v240_v20 = vadd.f32 %v239_v19, %v1262_v11  ;;  %v268_v21 = vpop.f32.mrf.mxu3  ;;  %498 = vmatmul.bf16.vlgmr.msrb.gmra.mxu1 %v310_v17 }
 0x126   :  { %v269_v22 = vadd.f32 %v268_v21, %v1265_v13  ;;  %v213_v23 = vpop.f32.mrf.mxu0 }
 0x127   :  { %v290_v25 = vmax.f32 %v240_v20, 0.0  ;;  %v214_v31 = vadd.f32 %v213_v23, %v1255_v63 }
 0x128   :  { %v291_v27 = vmax.f32 %v269_v22, 0.0 }
 0x129   :  { %v311_v28 = vpack.c.bf16 %v290_v25, %v287_v24  ;;  %v292_v35 = vmax.f32 %v214_v31, 0.0 }
 0x12a   :  { %v312_v29 = vpack.c.bf16 %v291_v27, %v288_v26 }
 0x12b   :  { %527 = vmatmul.bf16.vlgmr.msrb.gmra.mxu2 %v311_v28 }
 0x12c   :  { %976 = vmatmul.msk.bf16.vlgmr.msrb.gmra.mxu3 %vm473_vm3, %v312_v29  ;;  %v242_v30 = vpop.f32.mrf.mxu2 }
 0x12d   :  { %v271_v32 = vpop.f32.mrf.mxu3  ;;  %v243_v37 = vadd.f32 %v242_v30, %v1262_v11 }
 0x12e   :  { %v215_v33 = vpop.f32.mrf.mxu0  ;;  %v272_v39 = vadd.f32 %v271_v32, %v1265_v13 }
 0x12f   :  { %v216_v34 = vadd.f32 %v215_v33, %v1255_v63  ;;  %v293_v45 = vmax.f32 %v243_v37, 0.0 }
 0x130   :  { %v294_v47 = vmax.f32 %v272_v39, 0.0 }
 0x131   :  { %v295_v36 = vmax.f32 %v216_v34, 0.0 }
 0x133   :  { %v313_v38 = vpack.c.bf16 %v295_v36, %v292_v35 }
 0x134   :  { %v244_v40 = vpop.f32.mrf.mxu2 }
 0x135   :  { %v245_v41 = vadd.f32 %v244_v40, %v1262_v11  ;;  %v273_v42 = vpop.f32.mrf.mxu3  ;;  %503 = vmatmul.bf16.gmra.mxu1 %v313_v38 }
 0x136   :  { %v274_v43 = vadd.f32 %v273_v42, %v1265_v13  ;;  %v218_v44 = vpop.f32.mrf.mxu1 }
 0x137   :  { %v296_v46 = vmax.f32 %v245_v41, 0.0  ;;  %v219_v52 = vadd.f32 %v218_v44, %v1255_v63 }
 0x138   :  { %v297_v48 = vmax.f32 %v274_v43, 0.0 }
 0x139   :  { %v314_v49 = vpack.c.bf16 %v296_v46, %v293_v45  ;;  %v298_v56 = vmax.f32 %v219_v52, 0.0 }
 0x13a   :  { %v315_v50 = vpack.c.bf16 %v297_v48, %v294_v47 }
 0x13b   :  { %532 = vmatmul.bf16.gmra.mxu2 %v314_v49 }
 0x13c   :  { %977 = vmatmul.msk.bf16.gmra.mxu3 %vm473_vm3, %v315_v50  ;;  %v247_v51 = vpop.f32.mrf.mxu2 }
 0x13d   :  { %v276_v53 = vpop.f32.mrf.mxu3  ;;  %v248_v58 = vadd.f32 %v247_v51, %v1262_v11 }
 0x13e   :  { %v220_v54 = vpop.f32.mrf.mxu1  ;;  %v277_v61 = vadd.f32 %v276_v53, %v1265_v13 }
 0x13f   :  { %v221_v55 = vadd.f32 %v220_v54, %v1255_v63  ;;  %v299_v8 = vmax.f32 %v248_v58, 0.0 }
 0x140   :  { %v300_v10 = vmax.f32 %v277_v61, 0.0 }
 0x141   :  { %v301_v57 = vmax.f32 %v221_v55, 0.0 }
 0x143   :  { %v316_v59 = vpack.c.bf16 %v301_v57, %v298_v56 }
 0x144   :  { %v249_v62 = vpop.f32.mrf.mxu2 }
 0x145   :  { %v250_v0 = vadd.f32 %v249_v62, %v1262_v11  ;;  %v278_v1 = vpop.f32.mrf.mxu3  ;;  %508 = vmatmul.bf16.gmra.mxu1 %v316_v59 }
 0x146   :  { %v279_v2 = vadd.f32 %v278_v1, %v1265_v13  ;;  %v223_v3 = vpop.f32.mrf.mxu1 }
 0x147   :  { %v302_v9 = vmax.f32 %v250_v0, 0.0  ;;  %v224_v17 = vadd.f32 %v223_v3, %v1255_v63 }
 0x148   :  { %v303_v12 = vmax.f32 %v279_v2, 0.0 }
 0x149   :  { %v317_v14 = vpack.c.bf16 %v302_v9, %v299_v8  ;;  %v304_v21 = vmax.f32 %v224_v17, 0.0 }
 0x14a   :  { %v318_v15 = vpack.c.bf16 %v303_v12, %v300_v10 }
 0x14b   :  { %537 = vmatmul.bf16.gmra.mxu2 %v317_v14 }
 0x14c   :  { %978 = vmatmul.msk.bf16.gmra.mxu3 %vm473_vm3, %v318_v15  ;;  %v252_v16 = vpop.f32.mrf.mxu2 }
 0x14d   :  { %v281_v18 = vpop.f32.mrf.mxu3  ;;  %v253_v23 = vadd.f32 %v252_v16, %v1262_v11 }
 0x14e   :  { %v225_v19 = vpop.f32.mrf.mxu1  ;;  %v282_v25 = vadd.f32 %v281_v18, %v1265_v13 }
 0x14f   :  { %v226_v20 = vadd.f32 %v225_v19, %v1255_v63  ;;  %v305_v30 = vmax.f32 %v253_v23, 0.0 }
 0x150   :  { %v306_v32 = vmax.f32 %v282_v25, 0.0  ;;  %v1058_v25 = vld [vmem:[%s1381_s4 + $0x28] sm:$0xff] }
 0x151   :  { %v307_v22 = vmax.f32 %v226_v20, 0.0 }
 0x153   :  { %v319_v24 = vpack.c.bf16 %v307_v22, %v304_v21  ;;  %v635_v21 = vld [vmem:[%s1381_s4 + $0x30] sm:$0x3] }
 0x154   :  { %v254_v26 = vpop.f32.mrf.mxu2  ;;  %v661_v22 = vunpack.c.l.b16 %v635_v21 }
 0x155   :  { %v255_v27 = vadd.f32 %v254_v26, %v1262_v11  ;;  %v283_v28 = vpop.f32.mrf.mxu3  ;;  %513 = vmatmul.bf16.gmra.mxu1 %v319_v24  ;;  %v1057_v26 = vld [vmem:[%s1381_s4 + $0x20] sm:$0xff] }
 0x156   :  { %v284_v29 = vadd.f32 %v283_v28, %v1265_v13  ;;  %v668_v23 = vpack.c.b16 %v661_v22, %v661_v22  ;;  %v1055_v28 = vld [vmem:[%s1381_s4 + $0x10] sm:$0xff] }
 0x157   :  { %v308_v31 = vmax.f32 %v255_v27, 0.0  ;;  %v1056_v27 = vld [vmem:[%s1381_s4 + $0x18] sm:$0xff] }
 0x158   :  { %v309_v33 = vmax.f32 %v284_v29, 0.0  ;;  %v690_v24 = vsel %vm688_vm4, %v668_v23, 0  ;;  %v1054_v29 = vld [vmem:[%s1381_s4 + $0x8] sm:$0xff] }
 0x159   :  { %v320_v34 = vpack.c.bf16 %v308_v31, %v305_v30  ;;  %693 = vmatpush.bf16.msra.mxu1 %v690_v24  ;;  %v1053_v30 = vld [vmem:[%s1381_s4] sm:$0xff] }
 0x15a   :  { %v321_v63 = vpack.c.bf16 %v309_v33, %v306_v32  ;;  %v581_v32 = vperm.slane %v1252_v60, 1 }
 0x15b   :  { %542 = vmatmul.bf16.gmra.mxu2 %v320_v34 }
 0x15c   :  { %979 = vmatmul.msk.bf16.gmra.mxu3 %vm473_vm3, %v321_v63 }
 0x15d   :  { %694 = vmatpush.bf16.msra.mxu1 %v1058_v25 }
 0x161   :  { %695 = vmatpush.bf16.msra.mxu1 %v1057_v26 }
 0x165   :  { %696 = vmatpush.bf16.msra.mxu1 %v1056_v27 }
 0x169   :  { %697 = vmatpush.bf16.msra.mxu1 %v1055_v28 }
 0x16d   :  { %698 = vmatpush.bf16.msra.mxu1 %v1054_v29 }
 0x171   :  { %699 = vmatpush.bf16.msra.mxu1 %v1053_v30 }
 0x1a2   :  { %v499_v35 = vpop.f32.mrf.mxu1 }
 0x1aa   :  { %v501_v36 = vpop.f32.mrf.mxu1 }
 0x1ae   :  { %v528_v37 = vpop.f32.mrf.mxu2 }
 0x1af   :  { %v529_v38 = vadd.f32 %v528_v37, %v499_v35  ;;  %v557_v39 = vpop.f32.mrf.mxu3 }
 0x1b1   :  { %v558_v40 = vadd.f32 %v557_v39, %v529_v38 }
 0x1b2   :  { %v504_v11 = vpop.f32.mrf.mxu1 }
 0x1b6   :  { %v530_v41 = vpop.f32.mrf.mxu2 }
 0x1b7   :  { %v559_v42 = vpop.f32.mrf.mxu3  ;;  %v531_v14 = vadd.f32 %v530_v41, %v501_v36 }
 0x1b9   :  { %v560_v18 = vadd.f32 %v559_v42, %v531_v14 }
 0x1ba   :  { %v506_v43 = vpop.f32.mrf.mxu1 }
 0x1bb   :  { %v577_v20 = vpack.c.bf16 %v560_v18, %v558_v40 }
 0x1be   :  { %v533_v13 = vpop.f32.mrf.mxu2 }
 0x1bf   :  { %v562_v44 = vpop.f32.mrf.mxu3  ;;  %v534_v10 = vadd.f32 %v533_v13, %v504_v11 }
 0x1c1   :  { %v563_v17 = vadd.f32 %v562_v44, %v534_v10 }
 0x1c2   :  { %v509_v47 = vpop.f32.mrf.mxu1 }
 0x1c6   :  { %v535_v45 = vpop.f32.mrf.mxu2 }
 0x1c7   :  { %v564_v46 = vpop.f32.mrf.mxu3  ;;  %v536_v3 = vadd.f32 %v535_v45, %v506_v43 }
 0x1c9   :  { %v565_v15 = vadd.f32 %v564_v46, %v536_v3 }
 0x1ca   :  { %v511_v50 = vpop.f32.mrf.mxu1 }
 0x1cb   :  { %v578_v19 = vpack.c.bf16 %v565_v15, %v563_v17 }
 0x1ce   :  { %v538_v48 = vpop.f32.mrf.mxu2 }
 0x1cf   :  { %v567_v49 = vpop.f32.mrf.mxu3  ;;  %v539_v0 = vadd.f32 %v538_v48, %v509_v47 }
 0x1d1   :  { %v568_v12 = vadd.f32 %v567_v49, %v539_v0 }
 0x1d2   :  { %v514_v53 = vpop.f32.mrf.mxu1 }
 0x1d6   :  { %v540_v51 = vpop.f32.mrf.mxu2 }
 0x1d7   :  { %v569_v52 = vpop.f32.mrf.mxu3  ;;  %v541_v59 = vadd.f32 %v540_v51, %v511_v50 }
 0x1d9   :  { %v570_v8 = vadd.f32 %v569_v52, %v541_v59 }
 0x1da   :  { %v516_v57 = vpop.f32.mrf.mxu1 }
 0x1db   :  { %v579_v16 = vpack.c.bf16 %v570_v8, %v568_v12  ;;  %v767_v12 = vld [vmem:[%s1382_s5] sm:$0xf] }
 0x1dc   :  { %v784_v14 = vsel %vm782_vm6, %v767_v12, 0 }
 0x1dd   :  { %793 = vmatpush.bf16.msra.mxu3 %v784_v14 }
 0x1de   :  { %v543_v54 = vpop.f32.mrf.mxu2 }
 0x1df   :  { %v572_v55 = vpop.f32.mrf.mxu3  ;;  %v544_v56 = vadd.f32 %v543_v54, %v514_v53 }
 0x1e1   :  { %v573_v1 = vadd.f32 %v572_v55, %v544_v56 }
 0x1e6   :  { %v545_v58 = vpop.f32.mrf.mxu2 }
 0x1e7   :  { %v546_v61 = vadd.f32 %v545_v58, %v516_v57  ;;  %v574_v62 = vpop.f32.mrf.mxu3 }
 0x1e9   :  { %v575_v2 = vadd.f32 %v574_v62, %v546_v61 }
 0x1eb   :  { %v580_v9 = vpack.c.bf16 %v575_v2, %v573_v1 }
 0x1ed   :  { %586 = vmatpush.bf16.msra.mxu0 %v580_v9 }
 0x1f1   :  { %587 = vmatpush.bf16.msra.mxu0 %v579_v16  ;;  %v725_v16 = vperm.slane %v1252_v60, 2 }
 0x1f5   :  { %588 = vmatpush.bf16.msra.mxu0 %v578_v19 }
 0x1f9   :  { %589 = vmatpush.bf16.msra.mxu0 %v577_v20 }
 0x1fc   :  { %980 = vmatmul.msk.bf16.vlgmr.msra.gmra.mxu0 %vm89_vm0, %v1116_v4 }
 0x20c   :  { %981 = vmatmul.msk.bf16.gmra.mxu0 %vm89_vm0, %v1123_v5 }
 0x21c   :  { %982 = vmatmul.msk.bf16.gmra.mxu0 %vm89_vm0, %v1130_v6 }
 0x22c   :  { %983 = vmatmul.msk.bf16.gmra.mxu0 %vm89_vm0, %v1137_v7 }
 0x279   :  { %v591_v31 = vpop.f32.mrf.mxu0 }
 0x27a   :  { %v592_v33 = vadd.f32 %v591_v31, %v581_v32 }
 0x27c   :  { %v611_v35 = vmax.f32 %v592_v33, 0.0 }
 0x281   :  { %v593_v34 = vpop.f32.mrf.mxu0 }
 0x282   :  { %v594_v63 = vadd.f32 %v593_v34, %v581_v32 }
 0x284   :  { %v612_v36 = vmax.f32 %v594_v63, 0.0 }
 0x286   :  { %v619_v37 = vpack.c.bf16 %v612_v36, %v611_v35 }
 0x288   :  { %1008 = vmatmul.msk.bf16.vlgmr.msra.gmra.mxu1 %vm675_vm5, %v619_v37 }
 0x289   :  { %v596_v38 = vpop.f32.mrf.mxu0 }
 0x28a   :  { %v597_v39 = vadd.f32 %v596_v38, %v581_v32 }
 0x28c   :  { %v613_v41 = vmax.f32 %v597_v39, 0.0  ;;  %v768_v39 = vperm.slane %v1252_v60, 3 }
 0x291   :  { %v598_v40 = vpop.f32.mrf.mxu0 }
 0x292   :  { %v599_v11 = vadd.f32 %v598_v40, %v581_v32 }
 0x294   :  { %v614_v42 = vmax.f32 %v599_v11, 0.0 }
 0x296   :  { %v620_v43 = vpack.c.bf16 %v614_v42, %v613_v41 }
 0x298   :  { %1009 = vmatmul.msk.bf16.gmra.mxu1 %vm675_vm5, %v620_v43 }
 0x299   :  { %v601_v13 = vpop.f32.mrf.mxu0 }
 0x29a   :  { %v602_v44 = vadd.f32 %v601_v13, %v581_v32 }
 0x29c   :  { %v615_v47 = vmax.f32 %v602_v44, 0.0 }
 0x2a1   :  { %v603_v45 = vpop.f32.mrf.mxu0 }
 0x2a2   :  { %v604_v46 = vadd.f32 %v603_v45, %v581_v32 }
 0x2a4   :  { %v616_v48 = vmax.f32 %v604_v46, 0.0 }
 0x2a6   :  { %v621_v49 = vpack.c.bf16 %v616_v48, %v615_v47 }
 0x2a8   :  { %1010 = vmatmul.msk.bf16.gmra.mxu1 %vm675_vm5, %v621_v49 }
 0x2a9   :  { %v606_v50 = vpop.f32.mrf.mxu0 }
 0x2aa   :  { %v607_v51 = vadd.f32 %v606_v50, %v581_v32 }
 0x2ac   :  { %v617_v54 = vmax.f32 %v607_v51, 0.0 }
 0x2b1   :  { %v608_v52 = vpop.f32.mrf.mxu0 }
 0x2b2   :  { %v609_v53 = vadd.f32 %v608_v52, %v581_v32 }
 0x2b4   :  { %v618_v55 = vmax.f32 %v609_v53, 0.0 }
 0x2b6   :  { %v622_v56 = vpack.c.bf16 %v618_v55, %v617_v54 }
 0x2b8   :  { %1011 = vmatmul.msk.bf16.gmra.mxu1 %vm675_vm5, %v622_v56 }
 0x305   :  { %v701_v57 = vpop.f32.mrf.mxu1 }
 0x30d   :  { %v703_v58 = vpop.f32.mrf.mxu1 }
 0x30e   :  { %v721_v10 = vpack.c.bf16 %v703_v58, %v701_v57 }
 0x315   :  { %v706_v59 = vpop.f32.mrf.mxu1 }
 0x31d   :  { %v708_v61 = vpop.f32.mrf.mxu1 }
 0x31e   :  { %v722_v9 = vpack.c.bf16 %v708_v61, %v706_v59 }
 0x325   :  { %v711_v62 = vpop.f32.mrf.mxu1 }
 0x32d   :  { %v713_v0 = vpop.f32.mrf.mxu1 }
 0x32e   :  { %v723_v8 = vpack.c.bf16 %v713_v0, %v711_v62 }
 0x335   :  { %v716_v1 = vpop.f32.mrf.mxu1 }
 0x33d   :  { %v718_v2 = vpop.f32.mrf.mxu1 }
 0x33e   :  { %v724_v3 = vpack.c.bf16 %v718_v2, %v716_v1 }
 0x340   :  { %730 = vmatpush.bf16.msra.mxu2 %v724_v3 }
 0x344   :  { %731 = vmatpush.bf16.msra.mxu2 %v723_v8 }
 0x348   :  { %732 = vmatpush.bf16.msra.mxu2 %v722_v9 }
 0x34c   :  { %733 = vmatpush.bf16.msra.mxu2 %v721_v10 }
 0x34f   :  { %1012 = vmatmul.msk.bf16.vlgmr.msra.gmra.mxu2 %vm89_vm0, %v1116_v4 }
 0x35f   :  { %1013 = vmatmul.msk.bf16.gmra.mxu2 %vm89_vm0, %v1123_v5 }
 0x36f   :  { %1014 = vmatmul.msk.bf16.gmra.mxu2 %vm89_vm0, %v1130_v6 }
 0x37f   :  { %1015 = vmatmul.msk.bf16.gmra.mxu2 %vm89_vm0, %v1137_v7 }
 0x3d2   :  { %v735_v15 = vpop.f32.mrf.mxu2 }
 0x3d3   :  { %v736_v4 = vadd.f32 %v735_v15, %v725_v16 }
 0x3d5   :  { %v755_v5 = vmax.f32 %v736_v4, 0.0 }
 0x3da   :  { %v737_v17 = vpop.f32.mrf.mxu2 }
 0x3db   :  { %v738_v18 = vadd.f32 %v737_v17, %v725_v16 }
 0x3dd   :  { %v756_v19 = vmax.f32 %v738_v18, 0.0 }
 0x3df   :  { %v763_v20 = vpack.c.bf16 %v756_v19, %v755_v5 }
 0x3e1   :  { %1016 = vmatmul.msk.bf16.vlgmr.msra.gmra.mxu3 %vm769_vm7, %v763_v20 }
 0x3e2   :  { %v740_v21 = vpop.f32.mrf.mxu2 }
 0x3e3   :  { %v741_v22 = vadd.f32 %v740_v21, %v725_v16 }
 0x3e5   :  { %v757_v6 = vmax.f32 %v741_v22, 0.0 }
 0x3ea   :  { %v742_v23 = vpop.f32.mrf.mxu2 }
 0x3eb   :  { %v743_v24 = vadd.f32 %v742_v23, %v725_v16 }
 0x3ed   :  { %v758_v25 = vmax.f32 %v743_v24, 0.0 }
 0x3ef   :  { %v764_v26 = vpack.c.bf16 %v758_v25, %v757_v6 }
 0x3f1   :  { %1017 = vmatmul.msk.bf16.gmra.mxu3 %vm769_vm7, %v764_v26 }
 0x3f2   :  { %v745_v7 = vpop.f32.mrf.mxu2 }
 0x3f3   :  { %v746_v27 = vadd.f32 %v745_v7, %v725_v16 }
 0x3f5   :  { %v759_v30 = vmax.f32 %v746_v27, 0.0 }
 0x3fa   :  { %v747_v28 = vpop.f32.mrf.mxu2 }
 0x3fb   :  { %v748_v29 = vadd.f32 %v747_v28, %v725_v16 }
 0x3fd   :  { %v760_v31 = vmax.f32 %v748_v29, 0.0 }
 0x3ff   :  { %v765_v32 = vpack.c.bf16 %v760_v31, %v759_v30 }
 0x401   :  { %1018 = vmatmul.msk.bf16.gmra.mxu3 %vm769_vm7, %v765_v32 }
 0x402   :  { %v750_v33 = vpop.f32.mrf.mxu2 }
 0x403   :  { %v751_v34 = vadd.f32 %v750_v33, %v725_v16 }
 0x405   :  { %v761_v36 = vmax.f32 %v751_v34, 0.0 }
 0x40a   :  { %v752_v63 = vpop.f32.mrf.mxu2 }
 0x40b   :  { %v753_v35 = vadd.f32 %v752_v63, %v725_v16 }
 0x40d   :  { %v762_v37 = vmax.f32 %v753_v35, 0.0 }
 0x40f   :  { %v766_v38 = vpack.c.bf16 %v762_v37, %v761_v36 }
 0x411   :  { %1019 = vmatmul.msk.bf16.gmra.mxu3 %vm769_vm7, %v766_v38 }
 0x464   :  { %v795_v40 = vpop.f32.mrf.mxu3 }
 0x465   :  { %v796_v11 = vadd.f32 %v795_v40, %v768_v39 }
 0x467   :  { %816 = vst.msk [vmem:[%s1383_s7] sm:$0xff] %vm815_vm8, %v796_v11 }
 0x46c   :  { %v797_v41 = vpop.f32.mrf.mxu3 }
 0x46d   :  { %v798_v42 = vadd.f32 %v797_v41, %v768_v39 }
 0x46f   :  { %817 = vst.msk [vmem:[%s1383_s7 + $0x8] sm:$0xff] %vm815_vm8, %v798_v42 }
 0x474   :  { %v800_v43 = vpop.f32.mrf.mxu3 }
 0x475   :  { %v801_v13 = vadd.f32 %v800_v43, %v768_v39 }
 0x477   :  { %818 = vst.msk [vmem:[%s1383_s7 + $0x10] sm:$0xff] %vm815_vm8, %v801_v13 }
 0x47c   :  { %v802_v60 = vpop.f32.mrf.mxu3 }
 0x47d   :  { %v803_v44 = vadd.f32 %v802_v60, %v768_v39 }
 0x47f   :  { %819 = vst.msk [vmem:[%s1383_s7 + $0x18] sm:$0xff] %vm815_vm8, %v803_v44 }
 0x484   :  { %v805_v45 = vpop.f32.mrf.mxu3 }
 0x485   :  { %v806_v46 = vadd.f32 %v805_v45, %v768_v39 }
 0x487   :  { %820 = vst.msk [vmem:[%s1383_s7 + $0x20] sm:$0xff] %vm815_vm8, %v806_v46 }
 0x48c   :  { %v807_v47 = vpop.f32.mrf.mxu3 }
 0x48d   :  { %v808_v48 = vadd.f32 %v807_v47, %v768_v39 }
 0x48f   :  { %821 = vst.msk [vmem:[%s1383_s7 + $0x28] sm:$0xff] %vm815_vm8, %v808_v48 }
 0x494   :  { %v810_v49 = vpop.f32.mrf.mxu3 }
 0x495   :  { %v811_v50 = vadd.f32 %v810_v49, %v768_v39 }
 0x497   :  { %822 = vst.msk [vmem:[%s1383_s7 + $0x30] sm:$0xff] %vm815_vm8, %v811_v50 }
 0x49c   :  { %v812_v51 = vpop.f32.mrf.mxu3 }
 0x49d   :  { %v813_v52 = vadd.f32 %v812_v51, %v768_v39 }
 0x49f   :  { %823 = vst.msk [vmem:[%s1383_s7 + $0x38] sm:$0xff] %vm815_vm8, %v813_v52 }

</bundles_post_ra>
